<compile_context>
chip_gen: v5e
topology: v5e:2x2
jax: 0.10.0
libtpu: 0.0.40
codegen_flags: <defaults>
</compile_context>

<pallas_src>
import jax
import jax.numpy as jnp
from jax.experimental import pallas as pl
from jax.experimental.pallas import tpu as pltpu


# Tensors smaller than this never justify a kernel launch (per-step overhead
# ~0.35 us plus dispatch cost dwarfs a sub-MiB copy).
_SMALL_BYPASS_BYTES = 1 << 20


# --------------------------------------------------------------------------- #
# Kernels
# --------------------------------------------------------------------------- #
def _touch_kernel(x_ref, o_ref):
    # Output buffer is aliased to the input (input_output_aliases={0: 0}), so
    # the bytes are already correct; just mark the output as used.  No DMA,
    # no HBM traffic inside the kernel.
    del x_ref
    pltpu.touch(o_ref)


def _copy_kernel(x_ref, o_ref):
    # Plain tile pass-through (fallback path).
    o_ref[...] = x_ref[...]


# --------------------------------------------------------------------------- #
# Sizing helpers
# --------------------------------------------------------------------------- #
def _round_down(v, m):
    return (v // m) * m


def _round_up(v, m):
    return ((v + m - 1) // m) * m


def _vmem_capacity_bytes():
    """Physical VMEM per TensorCore; conservative 64 MiB (v7x) if unknown."""
    try:
        info = pltpu.get_tpu_info()
        return int(getattr(info, "vmem_capacity_bytes", 64 << 20))
    except Exception:
        # No TPU visible at trace time: fall back to the smallest generation's
        # budget (harmless on v5e/v6e, just slightly smaller tiles).
        return 64 << 20


def _budgets():
    """(vmem_limit_bytes, per-block byte budget), generation aware."""
    cap = _vmem_capacity_bytes()
    if cap >= (128 << 20):            # v5e / v6e: 128 MiB physical VMEM
        vmem_limit = 96 << 20
        block_budget = 16 << 20       # 2 in + 2 out buffers = 64 MiB <= 96 MiB
    else:                             # v7x: 64 MiB physical VMEM
        vmem_limit = 48 << 20
        block_budget = 8 << 20        # 4 * 8 MiB = 32 MiB <= 48 MiB
    return vmem_limit, block_budget


def _lane_dense_view(x):
    """Reshape to a 2-D row-major view; prefer a lane-dense (multiple-of-128)
    last dim so every store is an unmasked full-lane vst."""
    total = x.size
    for lanes in (16384, 8192, 4096, 2048, 1024, 512, 256, 128):
        if total % lanes == 0:
            return x.reshape(total // lanes, lanes), True
    if x.ndim >= 2:
        return x.reshape(-1, x.shape[-1]), False
    return x.reshape(1, total), False


def _choose_tiles(rows, cols, itemsize, block_budget, lane_dense):
    """Pick (tile_rows, tile_cols) that respect the (8,128) layout rules, stay
    within block_budget, keep blocks HBM-contiguous when possible, and leave
    >=2 programs on the row axis for v7x's two TensorCores."""
    row_pack = {1: 32, 2: 16}.get(itemsize, 8)   # sublane packing per dtype
    rows_probe = min(rows, row_pack)

    # ---- lane (last-dim) tile
    if lane_dense or cols * rows_probe * itemsize <= block_budget:
        tile_cols = cols                         # contiguous full-width blocks
    else:
        # Wide non-128-divisible rows that would bust the budget at full width:
        # 128-multiple lane tile (ragged last block is masked by Pallas), so a
        # block can never exceed block_budget (fixes the v7x VMEM overshoot).
        tile_cols = _round_down(block_budget // (rows_probe * itemsize), 128)
        tile_cols = max(128, min(tile_cols, _round_down(cols, 128)))

    # ---- sublane (row) tile
    if rows <= row_pack:
        tile_rows = rows                         # full extent: always legal
    else:
        budget_rows = _round_down(block_budget // max(tile_cols * itemsize, 1),
                                  row_pack)
        budget_rows = max(row_pack, budget_rows)
        # Keep at least 2 programs along the (parallel) row axis so both v7x
        # TensorCores issue DMAs on mid-size tensors; near-free on 1-TC chips.
        two_program_rows = _round_up(pl.cdiv(rows, 2), row_pack)
        tile_rows = max(row_pack, min(budget_rows, two_program_rows))

    return tile_rows, tile_cols


# --------------------------------------------------------------------------- #
# Pallas call wrappers
# --------------------------------------------------------------------------- #
def _identity_alias(x):
    """Zero-data-movement identity: ANY memory space, aliased output, no DMAs."""
    return pl.pallas_call(
        _touch_kernel,
        out_shape=jax.ShapeDtypeStruct(x.shape, x.dtype),
        in_specs=[pl.BlockSpec(memory_space=pl.ANY)],
        out_specs=pl.BlockSpec(memory_space=pl.ANY),
        input_output_aliases={0: 0},
        cost_estimate=pl.CostEstimate(flops=0, transcendentals=0,
                                      bytes_accessed=0),
    )(x)


def _identity_copy(x):
    """Tiled HBM->VMEM->HBM copy (bit-exact identity). Fallback / demo path."""
    if x.size == 0:
        return x

    orig_shape = x.shape
    itemsize = x.dtype.itemsize
    x2, lane_dense = _lane_dense_view(x)
    rows, cols = x2.shape

    vmem_limit, block_budget = _budgets()
    tile_rows, tile_cols = _choose_tiles(rows, cols, itemsize, block_budget,
                                         lane_dense)

    if tile_cols == cols:
        # Common case: fully contiguous blocks, degenerate column axis removed.
        grid = (pl.cdiv(rows, tile_rows),)
        in_spec = pl.BlockSpec((tile_rows, cols), lambda i: (i, 0))
        out_spec = pl.BlockSpec((tile_rows, cols), lambda i: (i, 0))
        dims = ("parallel",)
    else:
        grid = (pl.cdiv(rows, tile_rows), pl.cdiv(cols, tile_cols))
        in_spec = pl.BlockSpec((tile_rows, tile_cols), lambda i, j: (i, j))
        out_spec = pl.BlockSpec((tile_rows, tile_cols), lambda i, j: (i, j))
        dims = ("parallel", "parallel")

    out2 = pl.pallas_call(
        _copy_kernel,
        out_shape=jax.ShapeDtypeStruct((rows, cols), x.dtype),
        grid_spec=pltpu.PrefetchScalarGridSpec(
            num_scalar_prefetch=0,
            grid=grid,
            in_specs=[in_spec],
            out_specs=out_spec,
        ),
        # No input_output_aliases here: without donation at the call site it
        # would only add a hidden defensive copy (review feedback).
        cost_estimate=pl.CostEstimate(
            flops=0, transcendentals=0,
            bytes_accessed=2 * x.size * itemsize),
        compiler_params=pltpu.CompilerParams(
            dimension_semantics=dims,
            vmem_limit_bytes=vmem_limit,
        ),
    )(x2)
    return out2.reshape(orig_shape)


_ALIAS_KERNEL_OK = None  # cache: does the zero-movement kernel lower here?


def _identity_pallas(x):
    global _ALIAS_KERNEL_OK
    if _ALIAS_KERNEL_OK is not False:
        try:
            y = _identity_alias(x)
            _ALIAS_KERNEL_OK = True
            return y
        except Exception:
            _ALIAS_KERNEL_OK = False
    return _identity_copy(x)


def identity_map(x: jnp.ndarray, *, force_kernel: bool = False) -> jnp.ndarray:
    """IdentityMap.forward(x) -> x.

    Fast path: return x directly (empty or sub-1-MiB tensors — per-launch
    overhead dominates).  Kernel path: zero-data-movement aliased pass-through
    (falls back to a tiled copy if that cannot lower).  For true zero-copy,
    donate x at the call site (jax.jit(..., donate_argnums=...)).
    """
    if x.size == 0:
        return x
    if not force_kernel and x.size * x.dtype.itemsize < _SMALL_BYPASS_BYTES:
        return x
    return _identity_pallas(x)


# --------------------------------------------------------------------------- #
# Demo / self-test
# --------------------------------------------------------------------------- #
if __name__ == "__main__":
    key = jax.random.PRNGKey(0)

    # Multimodal-projector-style input: [batch, seq, hidden]
    B, S, H = 2, 8, 32
    x = jax.random.normal(key, (B, S, H), dtype=jnp.float32)

    # 1) Public forward (small tensor -> fast path, returns x unchanged).
    y_fast = jax.block_until_ready(identity_map(x))
    assert y_fast.shape == x.shape and y_fast.dtype == x.dtype
    assert bool(jnp.all(y_fast == x)), "identity mismatch (fast path)"

    # 2) Forced kernel path (zero-movement aliased kernel, copy fallback).
    y_kernel = jax.block_until_ready(identity_map(x, force_kernel=True))
    assert y_kernel.shape == x.shape and y_kernel.dtype == x.dtype
    assert bool(jnp.all(y_kernel == x)), "identity mismatch (kernel path)"

    # 3) Tiled-copy kernel: lane-dense path (element count divisible by 128).
    y_copy = jax.block_until_ready(_identity_copy(x))
    assert bool(jnp.all(y_copy == x)), "identity mismatch (copy kernel)"

    # 4) Tiled-copy kernel: non-128-divisible path (ragged / masked blocks).
    x_odd = jax.random.normal(jax.random.PRNGKey(1), (3, 5, 40), dtype=jnp.float32)
    y_odd = jax.block_until_ready(_identity_copy(x_odd))
    assert y_odd.shape == x_odd.shape and y_odd.dtype == x_odd.dtype
    assert bool(jnp.all(y_odd == x_odd)), "identity mismatch (odd-shape copy)"

    print("KERNEL_OK")
</pallas_src>

<mosaic_0001>
module attributes {stable_mosaic.version = 11 : i64} {
  func.func @_touch_kernel(%arg0: memref<2x8x32xf32, #tpu.memory_space<any>>, %arg1: memref<2x8x32xf32, #tpu.memory_space<any>>) attributes {dimension_semantics = [], scalar_prefetch = 0 : i64, scratch_operands = 0 : i64, tpu.core_type = #tpu.core_type<tc>} {
    return
  }
}

module attributes {stable_mosaic.version = 11 : i64} {
  func.func @_copy_kernel(%arg0: i32, %arg1: memref<1x512xf32, #tpu.memory_space<vmem>>, %arg2: memref<1x512xf32, #tpu.memory_space<vmem>>) attributes {dimension_semantics = [#tpu.dimension_semantics<parallel>], iteration_bounds = array<i64: 1>, scalar_prefetch = 0 : i64, scratch_operands = 0 : i64, tpu.core_type = #tpu.core_type<tc>, window_params = [{transform_indices = @transform_0, window_bounds = array<i64: 1, 512>}, {transform_indices = @transform_1, window_bounds = array<i64: 1, 512>}]} {
    %c0 = arith.constant 0 : index
    %c0_0 = arith.constant 0 : index
    %0 = vector.load %arg1[%c0, %c0_0] : memref<1x512xf32, #tpu.memory_space<vmem>>, vector<1x512xf32>
    %c0_1 = arith.constant 0 : index
    %c0_2 = arith.constant 0 : index
    %1 = vector.load %arg2[%c0_1, %c0_2] : memref<1x512xf32, #tpu.memory_space<vmem>>, vector<1x512xf32>
    tpu.vector_store %arg2[%c0_1, %c0_2], %0 {strides = array<i32>} : memref<1x512xf32, #tpu.memory_space<vmem>>, vector<1x512xf32>,
    return
  }
  func.func @transform_0(%arg0: i32) -> (i32, i32) {
    %c0_i32 = arith.constant 0 : i32
    %c0_i32_0 = arith.constant 0 : i32
    return %arg0, %c0_i32 : i32, i32
  }
  func.func @transform_1(%arg0: i32) -> (i32, i32) {
    %c0_i32 = arith.constant 0 : i32
    %c0_i32_0 = arith.constant 0 : i32
    return %arg0, %c0_i32 : i32, i32
  }
}

</mosaic_0001>

<bundles_post_ra>
// kernel: tpu_custom_call.1
= control target key start
LH: loop header
LB: loop body
LE: loop exit
PB: predicated region body
PF: predicated region fallthrough
CT: control target
= control target key end

     0   :  { %s16_s0 = inlined_call_operand.hbm [shape: f32[2,8,32], index: 0, kind: input, shape index: {}, may-alias: {0,1}]   ;;  %s17_s1 = inlined_call_operand.hbm [shape: f32[2,8,32], index: 1, kind: output, shape index: {}, may-alias: {0,1}]  }

// kernel: tpu_custom_call.1
= control target key start
LH: loop header
LB: loop body
LE: loop exit
PB: predicated region body
PF: predicated region fallthrough
CT: control target
= control target key end

     0   :  { %6 = vsyncpa [#allocation3], 0  ;;  %s118_s0 = inlined_call_operand.hbm [shape: f32[1,512], index: 0, kind: input, shape index: {}]   ;;  %s119_s1 = inlined_call_operand.hbm [shape: f32[1,512], index: 1, kind: output, shape index: {}]  }
   0x1   :  { %7 = vsyncpa [#allocation4], 0  ;;  %s13_s8 = sshll.u32 %s118_s0, 4  ;;  %s100_s9 = smov [#allocation2]   ;;  %s14_s8 = int_to_ptr.hbm [resolvable:$true] %s13_s8 }
   0x2   :  { %s15_s10 = sshll.u32 %s100_s9, 4  ;;  %s16_s10 = int_to_ptr.vmem [resolvable:$true] %s15_s10 }
   0x3   :  { %18 = dma.hbm_to_vmem [thread:$0]  %s14_s8, 64, %s16_s10, [#allocation3]  }
   0x4   :  { %96 = dma.done.wait [#allocation3], 64  }
   0x5   :  { %97 = vsyncadd [#allocation3], 4294967232  ;;  %v24_v0 = vlaneseq  ;;  %s101_s11 = smov [#allocation5]   ;;  %s36_s15 = sshll.u32 %s119_s1, 4  ;;  %v23_v1 = vld [vmem:[#allocation2] sm:$0xf]  ;;  %s37_s15 = int_to_ptr.hbm [resolvable:$true] %s36_s15 }
   0x6   :  { %s34_s12 = sshll.u32 %s101_s11, 4  ;;  %s35_s12 = int_to_ptr.vmem [resolvable:$true] %s34_s12 }
   0x7   :  { %vm26_vm0 = vcmp.lt.s32.totalorder %v24_v0, 512 }
   0x8   :  { %28 = vst.msk [vmem:[#allocation5] sm:$0xf] %vm26_vm0, %v23_v1 }
   0x9   :  { %39 = dma.vmem_to_hbm [thread:$0]  %s35_s12, 64, %s37_s15, [#allocation4]  }
   0xa   :  { %98 = dma.done.wait [#allocation4], 64  }
   0xb   :  { %99 = vsyncadd [#allocation4], 4294967232 }
   0xc   :  { %44 = vsyncpa [#allocation3], 1 }
   0xd   :  { %45 = vsyncpa [#allocation4], 1 }

</bundles_post_ra>
